<compile_context>
chip_gen: v5e
topology: v5e:2x2
jax: 0.10.0
libtpu: 0.0.40
codegen_flags: <defaults>
</compile_context>

<pallas_src>
import jax
import jax.numpy as jnp
from jax.experimental import pallas as pl
from jax.experimental.pallas import tpu as pltpu


def _se_kernel_c_last(x_ref, w1_ref, w2_ref, o_ref):
    """x_ref/o_ref: (1, HW, C); w1_ref: (C, C//r); w2_ref: (C//r, C)."""
    x = x_ref[...]                                                   # (1, HW, C)
    hw = x.shape[1]
    pooled = jnp.sum(x.astype(jnp.float32), axis=1) * (1.0 / hw)     # (1, C)
    h = jnp.maximum(
        jnp.dot(pooled, w1_ref[...], preferred_element_type=jnp.float32), 0.0)
    y = jax.nn.sigmoid(
        jnp.dot(h, w2_ref[...], preferred_element_type=jnp.float32))  # (1, C)
    o_ref[...] = (x.astype(jnp.float32) * y[:, None, :]).astype(o_ref.dtype)


def _se_kernel_c_first(x_ref, w1_ref, w2_ref, o_ref):
    """x_ref/o_ref: (1, C, HW); w1_ref: (C, C//r); w2_ref: (C//r, C)."""
    x = x_ref[...]                                                   # (1, C, HW)
    hw = x.shape[2]
    pooled = jnp.sum(x.astype(jnp.float32), axis=2) * (1.0 / hw)     # (1, C)
    h = jnp.maximum(
        jnp.dot(pooled, w1_ref[...], preferred_element_type=jnp.float32), 0.0)
    y = jax.nn.sigmoid(
        jnp.dot(h, w2_ref[...], preferred_element_type=jnp.float32))  # (1, C)
    o_ref[...] = (x.astype(jnp.float32) * y[:, :, None]).astype(o_ref.dtype)


def _prefer_channels_last(c, hw):
    """Put whichever of C / HW is lane-dense (mult. of 128) on the lane axis."""
    c_dense = (c % 128 == 0)
    hw_dense = (hw % 128 == 0)
    if c_dense != hw_dense:
        return c_dense
    return c >= hw


def _se_layer_impl(x_nchw, w1_t, w2_t):
    """x_nchw: (B, C, H, W); w1_t: (C, C//r); w2_t: (C//r, C) -> (B, C, H, W)."""
    b, c, h, w = x_nchw.shape
    hw = h * w
    itemsize = jnp.dtype(x_nchw.dtype).itemsize
    channels_last = _prefer_channels_last(c, hw)

    if channels_last:
        x_in = x_nchw.reshape(b, c, hw).transpose(0, 2, 1)           # (B, HW, C)
        kernel = _se_kernel_c_last
        block = (1, hw, c)
    else:
        x_in = x_nchw.reshape(b, c, hw)                              # (B, C, HW)
        kernel = _se_kernel_c_first
        block = (1, c, hw)

    hidden = w1_t.shape[1]
    cost = pl.CostEstimate(
        flops=2 * b * c * hw + 4 * b * c * hidden,
        transcendentals=b * c,
        bytes_accessed=2 * b * c * hw * itemsize,
    )

    out = pl.pallas_call(
        kernel,
        out_shape=jax.ShapeDtypeStruct(x_in.shape, x_in.dtype),
        grid=(b,),
        in_specs=[
            pl.BlockSpec(block, lambda i: (i, 0, 0)),
            pl.BlockSpec(w1_t.shape, lambda i: (0, 0)),   # resident weights
            pl.BlockSpec(w2_t.shape, lambda i: (0, 0)),   # resident weights
        ],
        out_specs=pl.BlockSpec(block, lambda i: (i, 0, 0)),
        input_output_aliases={0: 0},                      # reuse x's HBM buffer
        compiler_params=pltpu.CompilerParams(
            dimension_semantics=("parallel",)),
        cost_estimate=cost,
    )(x_in, w1_t, w2_t)

    if channels_last:
        return out.transpose(0, 2, 1).reshape(b, c, h, w)
    return out.reshape(b, c, h, w)


se_layer = jax.jit(_se_layer_impl)


def se_layer_ref(x_nchw, w1_t, w2_t):
    """Pure-JAX reference matching the PyTorch forward."""
    pooled = jnp.mean(x_nchw.astype(jnp.float32), axis=(2, 3))       # (B, C)
    hdn = jnp.maximum(pooled @ w1_t, 0.0)
    y = jax.nn.sigmoid(hdn @ w2_t)
    return (x_nchw.astype(jnp.float32) * y[:, :, None, None]).astype(x_nchw.dtype)


if __name__ == "__main__":
    key = jax.random.PRNGKey(0)

    # Two small configs, one per layout path:
    #   (2, 32, 8, 8):  HW on lanes  -> channels-first kernel
    #   (2, 128, 4, 4): C on lanes   -> channels-last kernel
    configs = [
        (2, 32, 8, 8, 16),
        (2, 128, 4, 4, 16),
    ]
    for (B, C, H, W, reduction) in configs:
        hidden = C // reduction
        kx, k1, k2, key = jax.random.split(key, 4)
        x = jax.random.normal(kx, (B, C, H, W), dtype=jnp.float32)
        # Weights stored pre-transposed: y = pooled @ W.T
        w1_t = jax.random.normal(k1, (C, hidden), dtype=jnp.float32) * 0.1
        w2_t = jax.random.normal(k2, (hidden, C), dtype=jnp.float32) * 0.1

        out = jax.block_until_ready(se_layer(x, w1_t, w2_t))
        ref = jax.block_until_ready(se_layer_ref(x, w1_t, w2_t))

        assert out.shape == (B, C, H, W)
        assert jnp.allclose(out, ref, atol=1e-5, rtol=1e-5), \
            f"mismatch vs reference for shape {(B, C, H, W)}"

    print("KERNEL_OK")
</pallas_src>

<mosaic_0001>
module attributes {stable_mosaic.version = 11 : i64} {
  func.func @_se_kernel_c_first(%arg0: i32, %arg1: memref<1x32x64xf32, #tpu.memory_space<vmem>>, %arg2: memref<32x2xf32, #tpu.memory_space<vmem>>, %arg3: memref<2x32xf32, #tpu.memory_space<vmem>>, %arg4: memref<1x32x64xf32, #tpu.memory_space<vmem>>) attributes {dimension_semantics = [#tpu.dimension_semantics<parallel>], iteration_bounds = array<i64: 2>, scalar_prefetch = 0 : i64, scratch_operands = 0 : i64, tpu.core_type = #tpu.core_type<tc>, window_params = [{transform_indices = @transform_0, window_bounds = array<i64: 1, 32, 64>}, {pipeline_mode = #tpu.pipeline_mode<synchronous>, transform_indices = @transform_1, window_bounds = array<i64: 32, 2>}, {pipeline_mode = #tpu.pipeline_mode<synchronous>, transform_indices = @transform_2, window_bounds = array<i64: 2, 32>}, {transform_indices = @transform_3, window_bounds = array<i64: 1, 32, 64>}]} {
    %c0 = arith.constant 0 : index
    %c0_0 = arith.constant 0 : index
    %c0_1 = arith.constant 0 : index
    %0 = vector.load %arg1[%c0, %c0_0, %c0_1] : memref<1x32x64xf32, #tpu.memory_space<vmem>>, vector<1x32x64xf32>
    %cst = arith.constant dense<0.000000e+00> : vector<1x32xf32>
    %1 = vector.multi_reduction <add>, %0, %cst [2] : vector<1x32x64xf32> to vector<1x32xf32>
    %cst_2 = arith.constant 1.562500e-02 : f32
    %2 = vector.broadcast %cst_2 : f32 to vector<1x32xf32>
    %3 = arith.mulf %1, %2 : vector<1x32xf32>
    %c0_3 = arith.constant 0 : index
    %c0_4 = arith.constant 0 : index
    %4 = vector.load %arg2[%c0_3, %c0_4] : memref<32x2xf32, #tpu.memory_space<vmem>>, vector<32x2xf32>
    %cst_5 = arith.constant dense<0.000000e+00> : vector<1x2xf32>
    %5 = tpu.matmul %3, %4, %cst_5 {dimension_numbers = #tpu.dot_dimension_numbers<[1], [0], [0], [1], [0, 0, 1, 1], [], []>} : vector<1x32xf32>, vector<32x2xf32>, vector<1x2xf32> -> vector<1x2xf32>
    %cst_6 = arith.constant 0.000000e+00 : f32
    %6 = vector.broadcast %cst_6 : f32 to vector<1x2xf32>
    %7 = arith.maximumf %5, %6 : vector<1x2xf32>
    %c0_7 = arith.constant 0 : index
    %c0_8 = arith.constant 0 : index
    %8 = vector.load %arg3[%c0_7, %c0_8] : memref<2x32xf32, #tpu.memory_space<vmem>>, vector<2x32xf32>
    %cst_9 = arith.constant dense<0.000000e+00> : vector<1x32xf32>
    %9 = tpu.matmul %7, %8, %cst_9 {dimension_numbers = #tpu.dot_dimension_numbers<[1], [0], [0], [1], [0, 0, 1, 1], [], []>} : vector<1x2xf32>, vector<2x32xf32>, vector<1x32xf32> -> vector<1x32xf32>
    %10 = arith.negf %9 : vector<1x32xf32>
    %11 = math.exp %10 : vector<1x32xf32>
    %cst_10 = arith.constant 1.000000e+00 : f32
    %12 = vector.broadcast %cst_10 : f32 to vector<1x32xf32>
    %13 = arith.addf %12, %11 : vector<1x32xf32>
    %14 = arith.divf %12, %13 : vector<1x32xf32>
    %15 = vector.shape_cast %14 : vector<1x32xf32> to vector<1x32x1xf32>
    %16 = vector.broadcast %15 : vector<1x32x1xf32> to vector<1x32x64xf32>
    %17 = arith.mulf %0, %16 : vector<1x32x64xf32>
    %c0_11 = arith.constant 0 : index
    %c0_12 = arith.constant 0 : index
    %c0_13 = arith.constant 0 : index
    %18 = vector.load %arg4[%c0_11, %c0_12, %c0_13] : memref<1x32x64xf32, #tpu.memory_space<vmem>>, vector<1x32x64xf32>
    tpu.vector_store %arg4[%c0_11, %c0_12, %c0_13], %17 {strides = array<i32>} : memref<1x32x64xf32, #tpu.memory_space<vmem>>, vector<1x32x64xf32>,
    return
  }
  func.func @transform_0(%arg0: i32) -> (i32, i32, i32) {
    %c0_i32 = arith.constant 0 : i32
    %c0_i32_0 = arith.constant 0 : i32
    %c0_i32_1 = arith.constant 0 : i32
    return %arg0, %c0_i32, %c0_i32_0 : i32, i32, i32
  }
  func.func @transform_1(%arg0: i32) -> (i32, i32) {
    %c0_i32 = arith.constant 0 : i32
    %c0_i32_0 = arith.constant 0 : i32
    %c0_i32_1 = arith.constant 0 : i32
    return %c0_i32, %c0_i32_0 : i32, i32
  }
  func.func @transform_2(%arg0: i32) -> (i32, i32) {
    %c0_i32 = arith.constant 0 : i32
    %c0_i32_0 = arith.constant 0 : i32
    %c0_i32_1 = arith.constant 0 : i32
    return %c0_i32, %c0_i32_0 : i32, i32
  }
  func.func @transform_3(%arg0: i32) -> (i32, i32, i32) {
    %c0_i32 = arith.constant 0 : i32
    %c0_i32_0 = arith.constant 0 : i32
    %c0_i32_1 = arith.constant 0 : i32
    return %arg0, %c0_i32, %c0_i32_0 : i32, i32, i32
  }
}

</mosaic_0001>

<bundles_post_ra>
// kernel: _se_layer_impl.1
= control target key start
LH: loop header
LB: loop body
LE: loop exit
PB: predicated region body
PF: predicated region fallthrough
CT: control target
= control target key end

     0   :  { %s437_s12 = smov 0   ;;  %s500_s0 = inlined_call_operand.vmem [shape: f32[2,32,64], index: 0, kind: input, shape index: {}, may-alias: {0,3}]   ;;  %s501_s1 = inlined_call_operand.vmem [shape: f32[32,2], index: 1, kind: input, shape index: {}]   ;;  %s502_s2 = inlined_call_operand.vmem [shape: f32[2,32], index: 2, kind: input, shape index: {}]   ;;  %s503_s3 = inlined_call_operand.vmem [shape: f32[2,32,64], index: 3, kind: output, shape index: {}, may-alias: {0,3}]  }
   0x1 LB: > { %s375_s13 = sadd.s32 4294967295, %s415_s12   ;;  %p379_p0 = scmp.ge.s32.totalorder %s415_s12, 1  ;;  %s415_s12 = sphi %s437_s12, %s13_s12  }
   0x2   : > { %p137_p1 = scmp.lt.s32.totalorder %s415_s12, 3 }
   0x4   : > { %p138_p2 = pnand %p379_p0, %p137_p1 }
   0x5   : > { %p161_p3 = scmp.lt.s32.totalorder (!%p138_p2), %s375_s13, 1 }
   0x6   : > { %141 = sbr.rel (%p138_p2) target bundleno = 550 (0x226), region = 32 }
   0xb   : > { %s505_s13 = smov (!%p161_p3, %s375_s13), 1  ;;  %vm175_vm0 = vcmask 523264   ;;  %v195_v8 = vld [vmem:[%s501_s1 + $0x18] sm:$0xff]  ;;  %v194_v9 = vld [vmem:[%s501_s1 + $0x10] sm:$0xff]  ;;  %v193_v10 = vld [vmem:[%s501_s1 + $0x8] sm:$0xff]  ;;  %v200_v12 = vlaneseq  ;;  %vm205_vm1 = vcmask 130112  }
   0xc   : > { %s390_s14 = sshll.u32 %s505_s13, 5  ;;  %230 = vmatpush.msra.mxu0 %v195_v8  ;;  %v192_v11 = vld [vmem:[%s501_s1] sm:$0xff]  ;;  %vm209_vm2 = vcmask 195712   ;;  %vm213_vm3 = vcmask 261312   ;;  %vm215_vm4 = vcmask 261120   ;;  %vm244_vm5 = vcmask 1041408  }
   0xd   : > { %s165_s17 = scalar_lea.vmem %s500_s0, %s390_s14  ;;  %v201_v15 = vand.u32 127, %v200_v12  ;;  %v239_v32 = vld [vmem:[%s502_s2] sm:$0x3]  ;;  %vm240_vm6 = vcmask 15360   ;;  %v289_v35 = vshrl.u32 %v200_v12, 7  ;;  %s170_s30 = scalar_lea.vmem %s503_s3, %s390_s14 }
   0xe   : > { %v453_v0 = vld [vmem:[%s165_s17] sm:$0xff]  ;;  %v455_v1 = vld [vmem:[%s165_s17 + $0x10] sm:$0xff]  ;;  %v461_v4 = vld [vmem:[%s165_s17 + $0x8] sm:$0xff]  ;;  %231 = vmatpush.msra.mxu0 %v194_v9  ;;  %385 = vmatpush.msk.msra.mxu1 %vm244_vm5, %v239_v32 }
   0xf   : > { %v176_v2 = vsel %vm175_vm0, %v453_v0, 0.0  ;;  %v182_v3 = vsel %vm175_vm0, %v455_v1, 0.0  ;;  %v463_v5 = vld [vmem:[%s165_s17 + $0x18] sm:$0xff]  ;;  %v179_v6 = vsel %vm175_vm0, %v461_v4, 0.0  ;;  %v203_v17 = vadd.s32 4294967288, %v201_v15  ;;  %400 = vset.pattern.permute.xlu2 %v289_v35 }
  0x10   : > { %177 = vadd.xlane.f32.xlu0 %v176_v2  ;;  %183 = vadd.xlane.f32.xlu1 %v182_v3  ;;  %v185_v7 = vsel %vm175_vm0, %v463_v5, 0.0  ;;  %v211_v18 = vadd.s32 4294967272, %v201_v15  ;;  %v207_v19 = vadd.s32 4294967280, %v201_v15  ;;  %v308_v36 = vadd.s32 24, %v289_v35 }
  0x11   : > { %232 = vmatpush.msra.mxu0 %v193_v10  ;;  %v302_v37 = vadd.s32 16, %v289_v35  ;;  %v296_v53 = vadd.s32 8, %v289_v35 }
  0x12   : > { %403 = vset.pattern.permute.xlu1 %v308_v36 }
  0x13   : > { %233 = vmatpush.msra.mxu0 %v192_v11  ;;  %402 = vset.pattern.permute.xlu0 %v302_v37 }
  0x18   : > { %180 = vadd.xlane.f32.xlu0 %v179_v6  ;;  %186 = vadd.xlane.f32.xlu1 %v185_v7 }
  0x83   : > { %v178_v13 = vpop.xlane.xlu0 %177  ;;  %v184_v14 = vpop.xlane.xlu1 %183 }
  0x84   : > { %v188_v16 = vmul.f32 0.015625, %v178_v13  ;;  %v190_v20 = vmul.f32 0.015625, %v184_v14 }
  0x86   : > { %v202_v25 = vperm.slane %v188_v16, %v201_v15  ;;  %v208_v28 = vperm.slane %v190_v20, %v207_v19 }
  0x8b   : > { %v181_v21 = vpop.xlane.xlu0 %180  ;;  %v187_v22 = vpop.xlane.xlu1 %186 }
  0x8c   : > { %v189_v23 = vmul.f32 0.015625, %v181_v21  ;;  %v191_v24 = vmul.f32 0.015625, %v187_v22 }
  0x8e   : > { %v204_v26 = vperm.slane %v189_v23, %v203_v17  ;;  %v212_v27 = vperm.slane %v191_v24, %v211_v18 }
  0x90   : > { %v206_v29 = vsel %vm205_vm1, %v204_v26, %v202_v25 }
  0x91   : > { %v210_v30 = vsel %vm209_vm2, %v208_v28, %v206_v29 }
  0x92   : > { %v214_v31 = vsel %vm213_vm3, %v212_v27, %v210_v30 }
  0x93   : > { %384 = vmatmul.msk.f32.vlgmr.msra.gmra.mxu0 %vm215_vm4, %v214_v31 }
 0x110   : > { %v235_v33 = vpop.f32.mrf.mxu0 }
 0x111   : > { %v238_v34 = vmax.f32 %v235_v33, 0.0 }
 0x113   : > { %386 = vmatmul.msk.f32.vlgmr.msra.gmra.mxu1 %vm240_vm6, %v238_v34 }
 0x190   : > { %v265_v38 = vpop.f32.mrf.mxu1 }
 0x191   : > { %v387_v39 = vmul.f32 -1.442695, %v265_v38 }
 0x193   : > { %405 = vpow2.f32 %v387_v39 }
 0x199   : > { %v406_v40 = vpop.eup %405 }
 0x19a   : > { %v271_v41 = vadd.f32 1.0, %v406_v40 }
 0x19c   : > { %407 = vrcp.f32 %v271_v41  ;;  %v283_v45 = vand.u32 2147483648, %v271_v41  ;;  %v281_v47 = vand.u32 2147483647, %v271_v41  ;;  %vm277_vm8 = vweird.f32 %v271_v41 }
 0x19e   : > { %v284_v49 = vor.u32 1.1754944e-38, %v283_v45  ;;  %vm282_vm10 = vcmp.eq.f32.partialorder %v281_v47, 8.507059e+37 }
 0x1a2   : > { %v408_v42 = vpop.eup %407 }
 0x1a3   : > { %v273_v43 = vmul.f32 %v408_v42, %v271_v41  ;;  %vm278_vm7 = vweird.f32 %v408_v42 }
 0x1a4   : > { %vm279_vm9 = vmor %vm277_vm8, %vm278_vm7 }
 0x1a5   : > { %v274_v44 = vsub.f32 1.0, %v273_v43 }
 0x1a7   : > { %v275_v46 = vmul.f32 %v408_v42, %v274_v44 }
 0x1a9   : > { %v276_v48 = vadd.f32 %v408_v42, %v275_v46 }
 0x1ab   : > { %v280_v50 = vsel %vm279_vm9, %v408_v42, %v276_v48 }
 0x1ac   : > { %v285_v51 = vsel %vm282_vm10, %v284_v49, %v280_v50 }
 0x1ad   : > { %v287_v52 = vperm.slane %v285_v51, 0 }
 0x1af   : > { %310 = vperm.xlu1 %403, %v287_v52   ;;  %304 = vperm.xlu0 %402, %v287_v52  }
 0x1b0   : > { %292 = vperm.xlu2 %400, %v287_v52  }
 0x1b7   : > { %404 = vset.pattern.permute.xlu0 %v308_v36 }
 0x1b8   : > { %401 = vset.pattern.permute.xlu2 %v296_v53 }
 0x1c0   : > { %298 = vperm.xlu2 %401, %v287_v52  }
 0x20a   : > { %v293_v54 = vpop.permute.xlu2 %292 }
 0x20b   : > { %v312_v55 = vmul.f32 %v293_v54, %v453_v0 }
 0x20d   : > { %316 = vst.msk [vmem:[%s170_s30] sm:$0xff] %vm175_vm0, %v312_v55 }
 0x21a   : > { %v299_v56 = vpop.permute.xlu2 %298 }
 0x21b   : > { %v313_v57 = vmul.f32 %v299_v56, %v461_v4 }
 0x21d   : > { %317 = vst.msk [vmem:[%s170_s30 + $0x8] sm:$0xff] %vm175_vm0, %v313_v57 }
 0x221   : > { %v311_v58 = vpop.permute.xlu1 %310  ;;  %v305_v59 = vpop.permute.xlu0 %304 }
 0x222   : > { %v315_v60 = vmul.f32 %v311_v58, %v463_v5  ;;  %v314_v61 = vmul.f32 %v305_v59, %v455_v1 }
 0x224   : > { %319 = vst.msk [vmem:[%s170_s30 + $0x18] sm:$0xff] %vm175_vm0, %v315_v60 }
 0x225   : > { %318 = vst.msk [vmem:[%s170_s30 + $0x10] sm:$0xff] %vm175_vm0, %v314_v61 }
 0x226 PF: > { %s13_s12 = sadd.s32 1, %s415_s12  }
 0x227   : > { %p10_p4 = scmp.ge.s32.totalorder %s13_s12, 4  }
 0x229   :  { %12 = sbr.rel (!%p10_p4) target bundleno = 1 (0x1), region = 62 }

</bundles_post_ra>
